<compile_context>
chip_gen: v7x
topology: tpu7x:2x2x1
jax: 0.10.0
libtpu: 0.0.40
codegen_flags: <defaults>
</compile_context>

<pallas_src>
import functools

import numpy as np
import jax
import jax.numpy as jnp
from jax import lax
from jax.experimental import pallas as pl
from jax.experimental.pallas import tpu as pltpu


# Finite "removed / invalid" sentinel.  Plain Python float so it is inlined as a
# jaxpr literal and never becomes a captured jax.Array constant inside the kernel.
_BIG = 3.0e38


def _round_up(v, m):
    return -(-v // m) * m


def _vmem_capacity_bytes():
    """Per-TensorCore VMEM; falls back to the smallest generation (v7x, 64 MiB)."""
    try:
        info = pltpu.get_tpu_info()
        cap = getattr(info, "vmem_capacity_bytes", None)
        if cap:
            return int(cap)
    except Exception:
        pass
    return 64 * 2 ** 20


_LIVE_FACTOR = 12   # ~live (tile_r, n_pad) f32-equivalent temporaries in the kernel


def _working_set_bytes(tile, n_pad, d_pad):
    live = _LIVE_FACTOR * tile * n_pad * 4
    resident = 2 * n_pad * d_pad * 4            # full x, double-buffered by the pipeline
    small = 6 * n_pad * 4 + 4 * tile * 4 * 4    # sq / label rows + packed output buffers
    return live + resident + small


def _pick_tile(n, d_pad, budget):
    """Largest row tile (multiple of 8, <= 1024) whose working set fits `budget`."""
    n8 = _round_up(max(n, 8), 8)
    tile = min(1024, n8)
    while tile > 8:
        if _working_set_bytes(tile, _round_up(n, tile), d_pad) <= budget:
            break
        tile -= 8
    n_pad = _round_up(n, tile)
    # v7x megacore: keep >= 2 parallel grid steps so both TensorCores get work.
    if n_pad // tile < 2 and n8 >= 16:
        tile = max(8, (tile // 2) // 8 * 8)
        n_pad = _round_up(n, tile)
    return tile, n_pad


def _knn_softmax_kernel(x_ref, sqc_ref, trow_ref, tcol_ref, out_ref,
                        *, alpha, k, weight, n_valid, tile_r, idx_bits):
    n_pad = x_ref.shape[0]

    i = pl.program_id(0)
    row_start = pl.multiple_of(i * tile_r, 8)
    x_rows = x_ref[pl.ds(row_start, tile_r), :]              # (TR, d_pad) row tile
    x_all = x_ref[...]                                        # (n_pad, d_pad) resident

    # ---- pairwise euclidean distances (euclidean_dist): this row tile vs all ----
    sq_r = jnp.sum(x_rows * x_rows, axis=1, keepdims=True)    # (TR, 1)
    sq_c = sqc_ref[...]                                        # (1, n_pad)
    g = lax.dot_general(x_rows, x_all,                         # contract along d, MXU
                        dimension_numbers=(((1,), (1,)), ((), ())),
                        preferred_element_type=jnp.float32)    # (TR, n_pad)
    dist = jnp.sqrt(jnp.maximum(sq_r + sq_c - 2.0 * g, 1e-12))

    # ---- masks (int32 label compare, absolute ids from program_id + iota) ----
    row_ids = row_start + lax.broadcasted_iota(jnp.int32, (tile_r, n_pad), 0)
    col_ids = lax.broadcasted_iota(jnp.int32, (tile_r, n_pad), 1)
    eye = row_ids == col_ids
    valid_col = col_ids < n_valid
    not_eye_valid = jnp.logical_not(eye) & valid_col           # shared mask
    row_valid = (row_start + lax.broadcasted_iota(jnp.int32, (tile_r, 1), 0)) < n_valid

    same = trow_ref[...] == tcol_ref[...]                      # (TR, n_pad)
    pos_mask = same & not_eye_valid
    neg_mask = jnp.logical_not(same) & valid_col

    # ---- per-row threshold = sorted(pos+neg distances)[k] ----
    # Packed-key selection: the column index is ORed into the low mantissa bits of
    # the (positive) distance bit pattern, making every key unique, so each
    # removal is ONE min + ONE select and removes exactly one element even under
    # exact ties.  The exact (unquantized) threshold is recovered afterwards by
    # looking up the distance of the surviving-minimum key.
    d_sel = jnp.where(not_eye_valid, dist, _BIG)
    hi_mask = -(1 << idx_bits)                                  # == ~((1 << idx_bits) - 1)
    key = lax.bitcast_convert_type(
        (lax.bitcast_convert_type(d_sel, jnp.int32) & hi_mask) | col_ids, jnp.float32)

    # k is a small static constant: fully unrolled at trace time for LLO visibility
    # (equivalent to lax.fori_loop(0, k, ..., unroll=True)).
    for _ in range(k):
        kmin = jnp.min(key, axis=1, keepdims=True)
        key = jnp.where(key == kmin, _BIG, key)

    tkey = jnp.min(key, axis=1, keepdims=True)
    threshold = jnp.min(jnp.where(key == tkey, d_sel, jnp.inf), axis=1, keepdims=True)

    below = dist < threshold
    pos_below = pos_mask & below
    neg_below = neg_mask & below
    cnt_pos = jnp.sum(pos_below.astype(jnp.float32), axis=1, keepdims=True)

    min_pos_all = jnp.min(jnp.where(pos_mask, dist, jnp.inf), axis=1, keepdims=True)
    # Harden rows without any positive pair (padded rows): keep the fallback finite
    # so no NaN/Inf is produced; such rows are zeroed by the row_valid select below.
    min_pos_all = jnp.where(min_pos_all < _BIG, min_pos_all, 1.0)
    min_pos_blw = jnp.min(jnp.where(pos_below, dist, jnp.inf), axis=1, keepdims=True)
    max_pos_blw = jnp.max(jnp.where(pos_below, dist, -jnp.inf), axis=1, keepdims=True)
    min_dsel = jnp.min(d_sel, axis=1, keepdims=True)

    # ---- softmax-style knn loss, log-sum-exp shifted (shift cancels exactly) ----
    fb_logit = alpha * (1.0 - min_pos_all)                      # closest-positive fallback
    row_m = jnp.maximum(alpha * (1.0 - min_dsel), fb_logit)     # >= every selected logit
    e = jnp.exp(alpha * (1.0 - dist) - row_m)                   # single EUP pass
    pos_e = jnp.sum(jnp.where(pos_below, e, 0.0), axis=1, keepdims=True)
    neg_e = jnp.sum(jnp.where(neg_below, e, 0.0), axis=1, keepdims=True)
    pos_logit = jnp.where(cnt_pos == 0.0, jnp.exp(fb_logit - row_m), pos_e)
    knn_loss = -jnp.log(pos_logit / (pos_logit + neg_e))

    cont_loss = jnp.where(cnt_pos == 0.0, min_pos_all,
                          jnp.where(cnt_pos == 1.0, max_pos_blw,
                                    max_pos_blw - min_pos_blw))
    raw_loss = knn_loss + weight * cont_loss                    # (TR, 1)

    # ---- packed per-row partials: [loss, acc flag, pos-dist sum, neg-dist sum] ----
    valid_f = row_valid.astype(jnp.float32)
    out_ref[:, 0:1] = jnp.where(row_valid, raw_loss, 0.0)
    out_ref[:, 1:2] = (row_valid & (raw_loss < 0.6)).astype(jnp.float32)
    out_ref[:, 2:3] = jnp.sum(jnp.where(pos_mask, dist, 0.0), axis=1,
                              keepdims=True) * valid_f
    out_ref[:, 3:4] = jnp.sum(jnp.where(neg_mask, dist, 0.0), axis=1,
                              keepdims=True) * valid_f


def knn_softmax_forward(inputs, targets, *, alpha=30.0, margin=1.0, k=16,
                        weight=1.0):
    """Returns (loss, accuracy, pos_d, neg_d) matching myKNNSoftmax.forward."""
    del margin  # nn.MarginRankingLoss(margin) is constructed but unused in forward
    n, d = inputs.shape
    d_pad = _round_up(d, 128)                        # lane-aligned MXU K dimension
    vmem_cap = _vmem_capacity_bytes()
    tile_r, n_pad = _pick_tile(n, d_pad, budget=int(vmem_cap * 0.6))
    num_tiles = n_pad // tile_r

    x = inputs.astype(jnp.float32)
    t = targets.astype(jnp.int32)                    # labels assumed >= 0 (pad = -1)
    x_p = jnp.pad(x, ((0, n_pad - n), (0, d_pad - d)))
    t_p = jnp.pad(t, (0, n_pad - n), constant_values=-1)

    sq_col = jnp.sum(x_p * x_p, axis=1).reshape(1, n_pad)      # tiny glue reduce
    t_row = t_p.reshape(n_pad, 1)
    t_col = t_p.reshape(1, n_pad)

    idx_bits = max(1, int(n_pad - 1).bit_length())
    kern = functools.partial(_knn_softmax_kernel, alpha=float(alpha), k=int(k),
                             weight=float(weight), n_valid=int(n),
                             tile_r=int(tile_r), idx_bits=idx_bits)

    full_x_spec = pl.BlockSpec((n_pad, d_pad), lambda i: (0, 0))
    full_row_spec = pl.BlockSpec((1, n_pad), lambda i: (0, 0))
    trow_spec = pl.BlockSpec((tile_r, 1), lambda i: (i, 0))
    out_spec = pl.BlockSpec((tile_r, 4), lambda i: (i, 0))

    cost = pl.CostEstimate(
        flops=2 * n_pad * n_pad * d_pad + (int(k) + 30) * n_pad * n_pad,
        transcendentals=n_pad * n_pad,
        bytes_accessed=n_pad * d_pad * 4 + 12 * n_pad * 4)

    vmem_est = _working_set_bytes(tile_r, n_pad, d_pad) + (2 << 20)
    vmem_limit = int(max(32 * 2 ** 20, min(vmem_est, int(vmem_cap * 0.9))))

    packed = pl.pallas_call(
        kern,
        grid=(num_tiles,),
        in_specs=[full_x_spec, full_row_spec, trow_spec, full_row_spec],
        out_specs=out_spec,
        out_shape=jax.ShapeDtypeStruct((n_pad, 4), jnp.float32),
        compiler_params=pltpu.CompilerParams(
            dimension_semantics=("parallel",),
            vmem_limit_bytes=vmem_limit),
        cost_estimate=cost,
    )(x_p, sq_col, t_row, t_col)

    loss = jnp.sum(packed[:, 0]) / n
    acc = jnp.sum(packed[:, 1]) / n
    # pos/neg pair counts come straight from the labels (moved out of the kernel).
    same = (t[:, None] == t[None, :]).astype(jnp.float32)
    sum_pcnt = jnp.sum(same) - n
    sum_ncnt = n * (n - 1) - sum_pcnt
    pos_d = jnp.sum(packed[:, 2]) / sum_pcnt
    neg_d = jnp.sum(packed[:, 3]) / sum_ncnt
    return loss, acc, pos_d, neg_d


def _reference_numpy(x, t, alpha=30.0, k=16, weight=1.0):
    """Faithful numpy port of the PyTorch forward (for validation)."""
    x = np.asarray(x, np.float64)
    t = np.asarray(t)
    n = x.shape[0]
    sq = (x * x).sum(1, keepdims=True)
    d2 = sq + sq.T - 2.0 * (x @ x.T)
    dist = np.sqrt(np.clip(d2, 1e-12, None))
    eye = np.eye(n, dtype=bool)
    same = t[:, None] == t[None, :]
    pos_mask = same & ~eye
    neg_mask = ~same
    losses, acc_num = [], 0
    for i in range(n):
        pos_pair = np.sort(dist[i][pos_mask[i]])
        neg_pair = dist[i][neg_mask[i]]
        pair = np.sort(np.concatenate([pos_pair, neg_pair]))
        thr = pair[k]
        pos_neig = pos_pair[pos_pair < thr]
        neg_neig = neg_pair[neg_pair < thr]
        if len(pos_neig) == 0:
            pos_neig = pos_pair[:1]
        pos_logit = np.sum(np.exp(alpha * (1.0 - pos_neig)))
        neg_logit = np.sum(np.exp(alpha * (1.0 - neg_neig)))
        knn_loss = -np.log(pos_logit / (pos_logit + neg_logit))
        cont = pos_neig[-1] if len(pos_neig) == 1 else pos_neig[-1] - pos_neig[0]
        l = knn_loss + weight * cont
        if l < 0.6:
            acc_num += 1
        losses.append(l)
    return (float(np.mean(losses)), acc_num / n,
            float(dist[pos_mask].mean()), float(dist[neg_mask].mean()))


if __name__ == "__main__":
    key = jax.random.PRNGKey(0)
    n_classes, per_class, dim = 5, 4, 32
    n = n_classes * per_class                     # 20 samples, k=16 <= n-2

    feats = jax.random.normal(key, (n, dim), dtype=jnp.float32)
    feats = feats / jnp.linalg.norm(feats, axis=1, keepdims=True)  # unit-norm embeddings
    targets = jnp.repeat(jnp.arange(n_classes, dtype=jnp.int32), per_class)

    result = knn_softmax_forward(feats, targets, alpha=30.0, k=16, weight=1.0)
    result = jax.block_until_ready(result)
    loss, acc, pos_d, neg_d = [float(v) for v in result]

    ref = _reference_numpy(np.asarray(feats), np.asarray(targets),
                           alpha=30.0, k=16, weight=1.0)
    assert np.allclose([loss, acc, pos_d, neg_d], ref, rtol=2e-3, atol=2e-3), (
        (loss, acc, pos_d, neg_d), ref)

    print("KERNEL_OK")
</pallas_src>

<mosaic_0001>
module attributes {stable_mosaic.version = 11 : i64} {
  func.func @_knn_softmax_kernel(%arg0: i32, %arg1: memref<24x128xf32, #tpu.memory_space<vmem>>, %arg2: memref<1x24xf32, #tpu.memory_space<vmem>>, %arg3: memref<8x1xi32, #tpu.memory_space<vmem>>, %arg4: memref<1x24xi32, #tpu.memory_space<vmem>>, %arg5: memref<8x4xf32, #tpu.memory_space<vmem>>) attributes {dimension_semantics = [#tpu.dimension_semantics<parallel>], iteration_bounds = array<i64: 3>, scalar_prefetch = 0 : i64, scratch_operands = 0 : i64, tpu.core_type = #tpu.core_type<tc>, window_params = [{pipeline_mode = #tpu.pipeline_mode<synchronous>, transform_indices = @transform_0, window_bounds = array<i64: 24, 128>}, {pipeline_mode = #tpu.pipeline_mode<synchronous>, transform_indices = @transform_1, window_bounds = array<i64: 1, 24>}, {transform_indices = @transform_2, window_bounds = array<i64: 8, 1>}, {pipeline_mode = #tpu.pipeline_mode<synchronous>, transform_indices = @transform_3, window_bounds = array<i64: 1, 24>}, {transform_indices = @transform_4, window_bounds = array<i64: 8, 4>}]} {
    %c8_i32 = arith.constant 8 : i32
    %0 = arith.muli %arg0, %c8_i32 : i32
    %1 = tpu.assume_multiple %0, 8 : i32
    %2 = arith.index_cast %1 : i32 to index
    %c0 = arith.constant 0 : index
    %3 = vector.load %arg1[%2, %c0] : memref<24x128xf32, #tpu.memory_space<vmem>>, vector<8x128xf32>
    %c0_0 = arith.constant 0 : index
    %c0_1 = arith.constant 0 : index
    %4 = vector.load %arg1[%c0_0, %c0_1] : memref<24x128xf32, #tpu.memory_space<vmem>>, vector<24x128xf32>
    %5 = arith.mulf %3, %3 : vector<8x128xf32>
    %cst = arith.constant dense<0.000000e+00> : vector<8xf32>
    %6 = vector.multi_reduction <add>, %5, %cst [1] : vector<8x128xf32> to vector<8xf32>
    %7 = vector.shape_cast %6 : vector<8xf32> to vector<8x1xf32>
    %c0_2 = arith.constant 0 : index
    %c0_3 = arith.constant 0 : index
    %8 = vector.load %arg2[%c0_2, %c0_3] : memref<1x24xf32, #tpu.memory_space<vmem>>, vector<1x24xf32>
    %cst_4 = arith.constant dense<0.000000e+00> : vector<8x24xf32>
    %9 = tpu.matmul %3, %4, %cst_4 {dimension_numbers = #tpu.dot_dimension_numbers<[1], [1], [0], [0], [0, 0, 1, 0], [], []>} : vector<8x128xf32>, vector<24x128xf32>, vector<8x24xf32> -> vector<8x24xf32>
    %10 = vector.broadcast %7 : vector<8x1xf32> to vector<8x24xf32>
    %11 = vector.broadcast %8 : vector<1x24xf32> to vector<8x24xf32>
    %12 = arith.addf %10, %11 : vector<8x24xf32>
    %cst_5 = arith.constant 2.000000e+00 : f32
    %13 = vector.broadcast %cst_5 : f32 to vector<8x24xf32>
    %14 = arith.mulf %13, %9 : vector<8x24xf32>
    %15 = arith.subf %12, %14 : vector<8x24xf32>
    %cst_6 = arith.constant 9.99999996E-13 : f32
    %16 = vector.broadcast %cst_6 : f32 to vector<8x24xf32>
    %17 = arith.maximumf %15, %16 : vector<8x24xf32>
    %18 = math.sqrt %17 : vector<8x24xf32>
    %19 = tpu.iota {dimensions = array<i32: 0>} : vector<8x24xi32>
    %20 = vector.broadcast %1 : i32 to vector<8x24xi32>
    %21 = arith.addi %20, %19 : vector<8x24xi32>
    %22 = tpu.iota {dimensions = array<i32: 1>} : vector<8x24xi32>
    %23 = arith.cmpi eq, %21, %22 : vector<8x24xi32>
    %c20_i32 = arith.constant 20 : i32
    %24 = vector.broadcast %c20_i32 : i32 to vector<8x24xi32>
    %25 = arith.cmpi slt, %22, %24 : vector<8x24xi32>
    %cst_7 = arith.constant dense<true> : vector<8x24xi1>
    %26 = arith.xori %23, %cst_7 : vector<8x24xi1>
    %27 = arith.andi %26, %25 : vector<8x24xi1>
    %28 = tpu.iota {dimensions = array<i32: 0>} : vector<8x1xi32>
    %29 = vector.broadcast %1 : i32 to vector<8x1xi32>
    %30 = arith.addi %29, %28 : vector<8x1xi32>
    %c20_i32_8 = arith.constant 20 : i32
    %31 = vector.broadcast %c20_i32_8 : i32 to vector<8x1xi32>
    %32 = arith.cmpi slt, %30, %31 : vector<8x1xi32>
    %c0_9 = arith.constant 0 : index
    %c0_10 = arith.constant 0 : index
    %33 = vector.load %arg3[%c0_9, %c0_10] : memref<8x1xi32, #tpu.memory_space<vmem>>, vector<8x1xi32>
    %c0_11 = arith.constant 0 : index
    %c0_12 = arith.constant 0 : index
    %34 = vector.load %arg4[%c0_11, %c0_12] : memref<1x24xi32, #tpu.memory_space<vmem>>, vector<1x24xi32>
    %35 = vector.broadcast %33 : vector<8x1xi32> to vector<8x24xi32>
    %36 = vector.broadcast %34 : vector<1x24xi32> to vector<8x24xi32>
    %37 = arith.cmpi eq, %35, %36 : vector<8x24xi32>
    %38 = arith.andi %37, %27 : vector<8x24xi1>
    %cst_13 = arith.constant dense<true> : vector<8x24xi1>
    %39 = arith.xori %37, %cst_13 : vector<8x24xi1>
    %40 = arith.andi %39, %25 : vector<8x24xi1>
    %cst_14 = arith.constant 3.000000e+38 : f32
    %41 = vector.broadcast %cst_14 : f32 to vector<8x24xf32>
    %42 = arith.select %27, %18, %41 : vector<8x24xi1>, vector<8x24xf32>
    %43 = tpu.bitcast %42 : vector<8x24xf32> -> vector<8x24xi32>
    %c-32_i32 = arith.constant -32 : i32
    %44 = vector.broadcast %c-32_i32 : i32 to vector<8x24xi32>
    %45 = arith.andi %43, %44 : vector<8x24xi32>
    %46 = arith.ori %45, %22 : vector<8x24xi32>
    %47 = tpu.bitcast %46 : vector<8x24xi32> -> vector<8x24xf32>
    %cst_15 = arith.constant dense<0x7F800000> : vector<8xf32>
    %48 = vector.multi_reduction <minimumf>, %47, %cst_15 [1] : vector<8x24xf32> to vector<8xf32>
    %49 = vector.shape_cast %48 : vector<8xf32> to vector<8x1xf32>
    %50 = vector.broadcast %49 : vector<8x1xf32> to vector<8x24xf32>
    %51 = arith.cmpf oeq, %47, %50 : vector<8x24xf32>
    %cst_16 = arith.constant 3.000000e+38 : f32
    %52 = vector.broadcast %cst_16 : f32 to vector<8x24xf32>
    %53 = arith.select %51, %52, %47 : vector<8x24xi1>, vector<8x24xf32>
    %cst_17 = arith.constant dense<0x7F800000> : vector<8xf32>
    %54 = vector.multi_reduction <minimumf>, %53, %cst_17 [1] : vector<8x24xf32> to vector<8xf32>
    %55 = vector.shape_cast %54 : vector<8xf32> to vector<8x1xf32>
    %56 = vector.broadcast %55 : vector<8x1xf32> to vector<8x24xf32>
    %57 = arith.cmpf oeq, %53, %56 : vector<8x24xf32>
    %cst_18 = arith.constant 3.000000e+38 : f32
    %58 = vector.broadcast %cst_18 : f32 to vector<8x24xf32>
    %59 = arith.select %57, %58, %53 : vector<8x24xi1>, vector<8x24xf32>
    %cst_19 = arith.constant dense<0x7F800000> : vector<8xf32>
    %60 = vector.multi_reduction <minimumf>, %59, %cst_19 [1] : vector<8x24xf32> to vector<8xf32>
    %61 = vector.shape_cast %60 : vector<8xf32> to vector<8x1xf32>
    %62 = vector.broadcast %61 : vector<8x1xf32> to vector<8x24xf32>
    %63 = arith.cmpf oeq, %59, %62 : vector<8x24xf32>
    %cst_20 = arith.constant 3.000000e+38 : f32
    %64 = vector.broadcast %cst_20 : f32 to vector<8x24xf32>
    %65 = arith.select %63, %64, %59 : vector<8x24xi1>, vector<8x24xf32>
    %cst_21 = arith.constant dense<0x7F800000> : vector<8xf32>
    %66 = vector.multi_reduction <minimumf>, %65, %cst_21 [1] : vector<8x24xf32> to vector<8xf32>
    %67 = vector.shape_cast %66 : vector<8xf32> to vector<8x1xf32>
    %68 = vector.broadcast %67 : vector<8x1xf32> to vector<8x24xf32>
    %69 = arith.cmpf oeq, %65, %68 : vector<8x24xf32>
    %cst_22 = arith.constant 3.000000e+38 : f32
    %70 = vector.broadcast %cst_22 : f32 to vector<8x24xf32>
    %71 = arith.select %69, %70, %65 : vector<8x24xi1>, vector<8x24xf32>
    %cst_23 = arith.constant dense<0x7F800000> : vector<8xf32>
    %72 = vector.multi_reduction <minimumf>, %71, %cst_23 [1] : vector<8x24xf32> to vector<8xf32>
    %73 = vector.shape_cast %72 : vector<8xf32> to vector<8x1xf32>
    %74 = vector.broadcast %73 : vector<8x1xf32> to vector<8x24xf32>
    %75 = arith.cmpf oeq, %71, %74 : vector<8x24xf32>
    %cst_24 = arith.constant 3.000000e+38 : f32
    %76 = vector.broadcast %cst_24 : f32 to vector<8x24xf32>
    %77 = arith.select %75, %76, %71 : vector<8x24xi1>, vector<8x24xf32>
    %cst_25 = arith.constant dense<0x7F800000> : vector<8xf32>
    %78 = vector.multi_reduction <minimumf>, %77, %cst_25 [1] : vector<8x24xf32> to vector<8xf32>
    %79 = vector.shape_cast %78 : vector<8xf32> to vector<8x1xf32>
    %80 = vector.broadcast %79 : vector<8x1xf32> to vector<8x24xf32>
    %81 = arith.cmpf oeq, %77, %80 : vector<8x24xf32>
    %cst_26 = arith.constant 3.000000e+38 : f32
    %82 = vector.broadcast %cst_26 : f32 to vector<8x24xf32>
    %83 = arith.select %81, %82, %77 : vector<8x24xi1>, vector<8x24xf32>
    %cst_27 = arith.constant dense<0x7F800000> : vector<8xf32>
    %84 = vector.multi_reduction <minimumf>, %83, %cst_27 [1] : vector<8x24xf32> to vector<8xf32>
    %85 = vector.shape_cast %84 : vector<8xf32> to vector<8x1xf32>
    %86 = vector.broadcast %85 : vector<8x1xf32> to vector<8x24xf32>
    %87 = arith.cmpf oeq, %83, %86 : vector<8x24xf32>
    %cst_28 = arith.constant 3.000000e+38 : f32
    %88 = vector.broadcast %cst_28 : f32 to vector<8x24xf32>
    %89 = arith.select %87, %88, %83 : vector<8x24xi1>, vector<8x24xf32>
    %cst_29 = arith.constant dense<0x7F800000> : vector<8xf32>
    %90 = vector.multi_reduction <minimumf>, %89, %cst_29 [1] : vector<8x24xf32> to vector<8xf32>
    %91 = vector.shape_cast %90 : vector<8xf32> to vector<8x1xf32>
    %92 = vector.broadcast %91 : vector<8x1xf32> to vector<8x24xf32>
    %93 = arith.cmpf oeq, %89, %92 : vector<8x24xf32>
    %cst_30 = arith.constant 3.000000e+38 : f32
    %94 = vector.broadcast %cst_30 : f32 to vector<8x24xf32>
    %95 = arith.select %93, %94, %89 : vector<8x24xi1>, vector<8x24xf32>
    %cst_31 = arith.constant dense<0x7F800000> : vector<8xf32>
    %96 = vector.multi_reduction <minimumf>, %95, %cst_31 [1] : vector<8x24xf32> to vector<8xf32>
    %97 = vector.shape_cast %96 : vector<8xf32> to vector<8x1xf32>
    %98 = vector.broadcast %97 : vector<8x1xf32> to vector<8x24xf32>
    %99 = arith.cmpf oeq, %95, %98 : vector<8x24xf32>
    %cst_32 = arith.constant 3.000000e+38 : f32
    %100 = vector.broadcast %cst_32 : f32 to vector<8x24xf32>
    %101 = arith.select %99, %100, %95 : vector<8x24xi1>, vector<8x24xf32>
    %cst_33 = arith.constant dense<0x7F800000> : vector<8xf32>
    %102 = vector.multi_reduction <minimumf>, %101, %cst_33 [1] : vector<8x24xf32> to vector<8xf32>
    %103 = vector.shape_cast %102 : vector<8xf32> to vector<8x1xf32>
    %104 = vector.broadcast %103 : vector<8x1xf32> to vector<8x24xf32>
    %105 = arith.cmpf oeq, %101, %104 : vector<8x24xf32>
    %cst_34 = arith.constant 3.000000e+38 : f32
    %106 = vector.broadcast %cst_34 : f32 to vector<8x24xf32>
    %107 = arith.select %105, %106, %101 : vector<8x24xi1>, vector<8x24xf32>
    %cst_35 = arith.constant dense<0x7F800000> : vector<8xf32>
    %108 = vector.multi_reduction <minimumf>, %107, %cst_35 [1] : vector<8x24xf32> to vector<8xf32>
    %109 = vector.shape_cast %108 : vector<8xf32> to vector<8x1xf32>
    %110 = vector.broadcast %109 : vector<8x1xf32> to vector<8x24xf32>
    %111 = arith.cmpf oeq, %107, %110 : vector<8x24xf32>
    %cst_36 = arith.constant 3.000000e+38 : f32
    %112 = vector.broadcast %cst_36 : f32 to vector<8x24xf32>
    %113 = arith.select %111, %112, %107 : vector<8x24xi1>, vector<8x24xf32>
    %cst_37 = arith.constant dense<0x7F800000> : vector<8xf32>
    %114 = vector.multi_reduction <minimumf>, %113, %cst_37 [1] : vector<8x24xf32> to vector<8xf32>
    %115 = vector.shape_cast %114 : vector<8xf32> to vector<8x1xf32>
    %116 = vector.broadcast %115 : vector<8x1xf32> to vector<8x24xf32>
    %117 = arith.cmpf oeq, %113, %116 : vector<8x24xf32>
    %cst_38 = arith.constant 3.000000e+38 : f32
    %118 = vector.broadcast %cst_38 : f32 to vector<8x24xf32>
    %119 = arith.select %117, %118, %113 : vector<8x24xi1>, vector<8x24xf32>
    %cst_39 = arith.constant dense<0x7F800000> : vector<8xf32>
    %120 = vector.multi_reduction <minimumf>, %119, %cst_39 [1] : vector<8x24xf32> to vector<8xf32>
    %121 = vector.shape_cast %120 : vector<8xf32> to vector<8x1xf32>
    %122 = vector.broadcast %121 : vector<8x1xf32> to vector<8x24xf32>
    %123 = arith.cmpf oeq, %119, %122 : vector<8x24xf32>
    %cst_40 = arith.constant 3.000000e+38 : f32
    %124 = vector.broadcast %cst_40 : f32 to vector<8x24xf32>
    %125 = arith.select %123, %124, %119 : vector<8x24xi1>, vector<8x24xf32>
    %cst_41 = arith.constant dense<0x7F800000> : vector<8xf32>
    %126 = vector.multi_reduction <minimumf>, %125, %cst_41 [1] : vector<8x24xf32> to vector<8xf32>
    %127 = vector.shape_cast %126 : vector<8xf32> to vector<8x1xf32>
    %128 = vector.broadcast %127 : vector<8x1xf32> to vector<8x24xf32>
    %129 = arith.cmpf oeq, %125, %128 : vector<8x24xf32>
    %cst_42 = arith.constant 3.000000e+38 : f32
    %130 = vector.broadcast %cst_42 : f32 to vector<8x24xf32>
    %131 = arith.select %129, %130, %125 : vector<8x24xi1>, vector<8x24xf32>
    %cst_43 = arith.constant dense<0x7F800000> : vector<8xf32>
    %132 = vector.multi_reduction <minimumf>, %131, %cst_43 [1] : vector<8x24xf32> to vector<8xf32>
    %133 = vector.shape_cast %132 : vector<8xf32> to vector<8x1xf32>
    %134 = vector.broadcast %133 : vector<8x1xf32> to vector<8x24xf32>
    %135 = arith.cmpf oeq, %131, %134 : vector<8x24xf32>
    %cst_44 = arith.constant 3.000000e+38 : f32
    %136 = vector.broadcast %cst_44 : f32 to vector<8x24xf32>
    %137 = arith.select %135, %136, %131 : vector<8x24xi1>, vector<8x24xf32>
    %cst_45 = arith.constant dense<0x7F800000> : vector<8xf32>
    %138 = vector.multi_reduction <minimumf>, %137, %cst_45 [1] : vector<8x24xf32> to vector<8xf32>
    %139 = vector.shape_cast %138 : vector<8xf32> to vector<8x1xf32>
    %140 = vector.broadcast %139 : vector<8x1xf32> to vector<8x24xf32>
    %141 = arith.cmpf oeq, %137, %140 : vector<8x24xf32>
    %cst_46 = arith.constant 3.000000e+38 : f32
    %142 = vector.broadcast %cst_46 : f32 to vector<8x24xf32>
    %143 = arith.select %141, %142, %137 : vector<8x24xi1>, vector<8x24xf32>
    %cst_47 = arith.constant dense<0x7F800000> : vector<8xf32>
    %144 = vector.multi_reduction <minimumf>, %143, %cst_47 [1] : vector<8x24xf32> to vector<8xf32>
    %145 = vector.shape_cast %144 : vector<8xf32> to vector<8x1xf32>
    %146 = vector.broadcast %145 : vector<8x1xf32> to vector<8x24xf32>
    %147 = arith.cmpf oeq, %143, %146 : vector<8x24xf32>
    %cst_48 = arith.constant 0x7F800000 : f32
    %148 = vector.broadcast %cst_48 : f32 to vector<8x24xf32>
    %149 = arith.select %147, %42, %148 : vector<8x24xi1>, vector<8x24xf32>
    %cst_49 = arith.constant dense<0x7F800000> : vector<8xf32>
    %150 = vector.multi_reduction <minimumf>, %149, %cst_49 [1] : vector<8x24xf32> to vector<8xf32>
    %151 = vector.shape_cast %150 : vector<8xf32> to vector<8x1xf32>
    %152 = vector.broadcast %151 : vector<8x1xf32> to vector<8x24xf32>
    %153 = arith.cmpf olt, %18, %152 : vector<8x24xf32>
    %154 = arith.andi %38, %153 : vector<8x24xi1>
    %155 = arith.andi %40, %153 : vector<8x24xi1>
    %156 = arith.extui %154 : vector<8x24xi1> to vector<8x24xi32>
    %157 = arith.sitofp %156 : vector<8x24xi32> to vector<8x24xf32>
    %cst_50 = arith.constant dense<0.000000e+00> : vector<8xf32>
    %158 = vector.multi_reduction <add>, %157, %cst_50 [1] : vector<8x24xf32> to vector<8xf32>
    %159 = vector.shape_cast %158 : vector<8xf32> to vector<8x1xf32>
    %cst_51 = arith.constant 0x7F800000 : f32
    %160 = vector.broadcast %cst_51 : f32 to vector<8x24xf32>
    %161 = arith.select %38, %18, %160 : vector<8x24xi1>, vector<8x24xf32>
    %cst_52 = arith.constant dense<0x7F800000> : vector<8xf32>
    %162 = vector.multi_reduction <minimumf>, %161, %cst_52 [1] : vector<8x24xf32> to vector<8xf32>
    %163 = vector.shape_cast %162 : vector<8xf32> to vector<8x1xf32>
    %cst_53 = arith.constant 3.000000e+38 : f32
    %164 = vector.broadcast %cst_53 : f32 to vector<8x1xf32>
    %165 = arith.cmpf olt, %163, %164 : vector<8x1xf32>
    %cst_54 = arith.constant 1.000000e+00 : f32
    %166 = vector.broadcast %cst_54 : f32 to vector<8x1xf32>
    %167 = arith.select %165, %163, %166 : vector<8x1xi1>, vector<8x1xf32>
    %cst_55 = arith.constant 0x7F800000 : f32
    %168 = vector.broadcast %cst_55 : f32 to vector<8x24xf32>
    %169 = arith.select %154, %18, %168 : vector<8x24xi1>, vector<8x24xf32>
    %cst_56 = arith.constant dense<0x7F800000> : vector<8xf32>
    %170 = vector.multi_reduction <minimumf>, %169, %cst_56 [1] : vector<8x24xf32> to vector<8xf32>
    %171 = vector.shape_cast %170 : vector<8xf32> to vector<8x1xf32>
    %cst_57 = arith.constant 0xFF800000 : f32
    %172 = vector.broadcast %cst_57 : f32 to vector<8x24xf32>
    %173 = arith.select %154, %18, %172 : vector<8x24xi1>, vector<8x24xf32>
    %cst_58 = arith.constant dense<0xFF800000> : vector<8xf32>
    %174 = vector.multi_reduction <maximumf>, %173, %cst_58 [1] : vector<8x24xf32> to vector<8xf32>
    %175 = vector.shape_cast %174 : vector<8xf32> to vector<8x1xf32>
    %cst_59 = arith.constant dense<0x7F800000> : vector<8xf32>
    %176 = vector.multi_reduction <minimumf>, %42, %cst_59 [1] : vector<8x24xf32> to vector<8xf32>
    %177 = vector.shape_cast %176 : vector<8xf32> to vector<8x1xf32>
    %cst_60 = arith.constant 1.000000e+00 : f32
    %178 = vector.broadcast %cst_60 : f32 to vector<8x1xf32>
    %179 = arith.subf %178, %167 : vector<8x1xf32>
    %cst_61 = arith.constant 3.000000e+01 : f32
    %180 = vector.broadcast %cst_61 : f32 to vector<8x1xf32>
    %181 = arith.mulf %180, %179 : vector<8x1xf32>
    %cst_62 = arith.constant 1.000000e+00 : f32
    %182 = vector.broadcast %cst_62 : f32 to vector<8x1xf32>
    %183 = arith.subf %182, %177 : vector<8x1xf32>
    %cst_63 = arith.constant 3.000000e+01 : f32
    %184 = vector.broadcast %cst_63 : f32 to vector<8x1xf32>
    %185 = arith.mulf %184, %183 : vector<8x1xf32>
    %186 = arith.maximumf %185, %181 : vector<8x1xf32>
    %cst_64 = arith.constant 1.000000e+00 : f32
    %187 = vector.broadcast %cst_64 : f32 to vector<8x24xf32>
    %188 = arith.subf %187, %18 : vector<8x24xf32>
    %cst_65 = arith.constant 3.000000e+01 : f32
    %189 = vector.broadcast %cst_65 : f32 to vector<8x24xf32>
    %190 = arith.mulf %189, %188 : vector<8x24xf32>
    %191 = vector.broadcast %186 : vector<8x1xf32> to vector<8x24xf32>
    %192 = arith.subf %190, %191 : vector<8x24xf32>
    %193 = math.exp %192 : vector<8x24xf32>
    %cst_66 = arith.constant 0.000000e+00 : f32
    %194 = vector.broadcast %cst_66 : f32 to vector<8x24xf32>
    %195 = arith.select %154, %193, %194 : vector<8x24xi1>, vector<8x24xf32>
    %cst_67 = arith.constant dense<0.000000e+00> : vector<8xf32>
    %196 = vector.multi_reduction <add>, %195, %cst_67 [1] : vector<8x24xf32> to vector<8xf32>
    %197 = vector.shape_cast %196 : vector<8xf32> to vector<8x1xf32>
    %cst_68 = arith.constant 0.000000e+00 : f32
    %198 = vector.broadcast %cst_68 : f32 to vector<8x24xf32>
    %199 = arith.select %155, %193, %198 : vector<8x24xi1>, vector<8x24xf32>
    %cst_69 = arith.constant dense<0.000000e+00> : vector<8xf32>
    %200 = vector.multi_reduction <add>, %199, %cst_69 [1] : vector<8x24xf32> to vector<8xf32>
    %201 = vector.shape_cast %200 : vector<8xf32> to vector<8x1xf32>
    %cst_70 = arith.constant 0.000000e+00 : f32
    %202 = vector.broadcast %cst_70 : f32 to vector<8x1xf32>
    %203 = arith.cmpf oeq, %159, %202 : vector<8x1xf32>
    %204 = arith.subf %181, %186 : vector<8x1xf32>
    %205 = math.exp %204 : vector<8x1xf32>
    %206 = arith.select %203, %205, %197 : vector<8x1xi1>, vector<8x1xf32>
    %207 = arith.addf %206, %201 : vector<8x1xf32>
    %208 = arith.divf %206, %207 : vector<8x1xf32>
    %209 = math.log %208 : vector<8x1xf32>
    %cst_71 = arith.constant 0.000000e+00 : f32
    %210 = vector.broadcast %cst_71 : f32 to vector<8x1xf32>
    %211 = arith.subf %210, %209 : vector<8x1xf32>
    %cst_72 = arith.constant 0.000000e+00 : f32
    %212 = vector.broadcast %cst_72 : f32 to vector<8x1xf32>
    %213 = arith.cmpf oeq, %159, %212 : vector<8x1xf32>
    %cst_73 = arith.constant 1.000000e+00 : f32
    %214 = vector.broadcast %cst_73 : f32 to vector<8x1xf32>
    %215 = arith.cmpf oeq, %159, %214 : vector<8x1xf32>
    %216 = arith.subf %175, %171 : vector<8x1xf32>
    %217 = arith.select %215, %175, %216 : vector<8x1xi1>, vector<8x1xf32>
    %218 = arith.select %213, %167, %217 : vector<8x1xi1>, vector<8x1xf32>
    %cst_74 = arith.constant 1.000000e+00 : f32
    %219 = vector.broadcast %cst_74 : f32 to vector<8x1xf32>
    %220 = arith.mulf %219, %218 : vector<8x1xf32>
    %221 = arith.addf %211, %220 : vector<8x1xf32>
    %222 = arith.extui %32 : vector<8x1xi1> to vector<8x1xi32>
    %223 = arith.sitofp %222 : vector<8x1xi32> to vector<8x1xf32>
    %cst_75 = arith.constant 0.000000e+00 : f32
    %224 = vector.broadcast %cst_75 : f32 to vector<8x1xf32>
    %225 = arith.select %32, %221, %224 : vector<8x1xi1>, vector<8x1xf32>
    %c0_76 = arith.constant 0 : index
    %c0_77 = arith.constant 0 : index
    %226 = vector.load %arg5[%c0_76, %c0_77] : memref<8x4xf32, #tpu.memory_space<vmem>>, vector<8x1xf32>
    tpu.vector_store %arg5[%c0_76, %c0_77], %225 {strides = array<i32>} : memref<8x4xf32, #tpu.memory_space<vmem>>, vector<8x1xf32>,
    %cst_78 = arith.constant 6.000000e-01 : f32
    %227 = vector.broadcast %cst_78 : f32 to vector<8x1xf32>
    %228 = arith.cmpf olt, %221, %227 : vector<8x1xf32>
    %229 = arith.andi %32, %228 : vector<8x1xi1>
    %230 = arith.extui %229 : vector<8x1xi1> to vector<8x1xi32>
    %231 = arith.sitofp %230 : vector<8x1xi32> to vector<8x1xf32>
    %c0_79 = arith.constant 0 : index
    %c1 = arith.constant 1 : index
    %232 = vector.load %arg5[%c0_79, %c1] : memref<8x4xf32, #tpu.memory_space<vmem>>, vector<8x1xf32>
    tpu.vector_store %arg5[%c0_79, %c1], %231 {strides = array<i32>} : memref<8x4xf32, #tpu.memory_space<vmem>>, vector<8x1xf32>,
    %cst_80 = arith.constant 0.000000e+00 : f32
    %233 = vector.broadcast %cst_80 : f32 to vector<8x24xf32>
    %234 = arith.select %38, %18, %233 : vector<8x24xi1>, vector<8x24xf32>
    %cst_81 = arith.constant dense<0.000000e+00> : vector<8xf32>
    %235 = vector.multi_reduction <add>, %234, %cst_81 [1] : vector<8x24xf32> to vector<8xf32>
    %236 = vector.shape_cast %235 : vector<8xf32> to vector<8x1xf32>
    %237 = arith.mulf %236, %223 : vector<8x1xf32>
    %c0_82 = arith.constant 0 : index
    %c2 = arith.constant 2 : index
    %238 = vector.load %arg5[%c0_82, %c2] : memref<8x4xf32, #tpu.memory_space<vmem>>, vector<8x1xf32>
    tpu.vector_store %arg5[%c0_82, %c2], %237 {strides = array<i32>} : memref<8x4xf32, #tpu.memory_space<vmem>>, vector<8x1xf32>,
    %cst_83 = arith.constant 0.000000e+00 : f32
    %239 = vector.broadcast %cst_83 : f32 to vector<8x24xf32>
    %240 = arith.select %40, %18, %239 : vector<8x24xi1>, vector<8x24xf32>
    %cst_84 = arith.constant dense<0.000000e+00> : vector<8xf32>
    %241 = vector.multi_reduction <add>, %240, %cst_84 [1] : vector<8x24xf32> to vector<8xf32>
    %242 = vector.shape_cast %241 : vector<8xf32> to vector<8x1xf32>
    %243 = arith.mulf %242, %223 : vector<8x1xf32>
    %c0_85 = arith.constant 0 : index
    %c3 = arith.constant 3 : index
    %244 = vector.load %arg5[%c0_85, %c3] : memref<8x4xf32, #tpu.memory_space<vmem>>, vector<8x1xf32>
    tpu.vector_store %arg5[%c0_85, %c3], %243 {strides = array<i32>} : memref<8x4xf32, #tpu.memory_space<vmem>>, vector<8x1xf32>,
    return
  }
  func.func @transform_0(%arg0: i32) -> (i32, i32) {
    %c0_i32 = arith.constant 0 : i32
    %c0_i32_0 = arith.constant 0 : i32
    %c0_i32_1 = arith.constant 0 : i32
    return %c0_i32, %c0_i32_0 : i32, i32
  }
  func.func @transform_1(%arg0: i32) -> (i32, i32) {
    %c0_i32 = arith.constant 0 : i32
    %c0_i32_0 = arith.constant 0 : i32
    %c0_i32_1 = arith.constant 0 : i32
    return %c0_i32, %c0_i32_0 : i32, i32
  }
  func.func @transform_2(%arg0: i32) -> (i32, i32) {
    %c0_i32 = arith.constant 0 : i32
    %c0_i32_0 = arith.constant 0 : i32
    return %arg0, %c0_i32 : i32, i32
  }
  func.func @transform_3(%arg0: i32) -> (i32, i32) {
    %c0_i32 = arith.constant 0 : i32
    %c0_i32_0 = arith.constant 0 : i32
    %c0_i32_1 = arith.constant 0 : i32
    return %c0_i32, %c0_i32_0 : i32, i32
  }
  func.func @transform_4(%arg0: i32) -> (i32, i32) {
    %c0_i32 = arith.constant 0 : i32
    %c0_i32_0 = arith.constant 0 : i32
    return %arg0, %c0_i32 : i32, i32
  }
}

</mosaic_0001>

<bundles_post_ra>
// kernel: tpu_custom_call.1
= control target key start
LH: loop header
LB: loop body
LE: loop exit
PB: predicated region body
PF: predicated region fallthrough
CT: control target
= control target key end

     0   :  { %s641_s15 = smov 0   ;;  %s796_s0 = inlined_call_operand.vmem [shape: f32[24,128], index: 0, kind: input, shape index: {}]   ;;  %s797_s1 = inlined_call_operand.vmem [shape: f32[1,24], index: 1, kind: input, shape index: {}]   ;;  %s798_s2 = inlined_call_operand.vmem [shape: s32[24,1], index: 2, kind: input, shape index: {}]   ;;  %s799_s3 = inlined_call_operand.vmem [shape: s32[1,24], index: 3, kind: input, shape index: {}]   ;;  %s800_s4 = inlined_call_operand.vmem [shape: f32[24,4], index: 4, kind: output, shape index: {}]  }
   0x1 LB: > { %s647_s16 = sadd.s32 4294967295, %s609_s15   ;;  %p551_p0 = scmp.ge.s32.totalorder %s609_s15, 1  ;;  %s609_s15 = sphi %s641_s15, %s14_s15  }
   0x2   : > { %p161_p1 = scmp.lt.s32.totalorder %s609_s15, 4 }
   0x4   : > { %p162_p2 = pnand %p551_p0, %p161_p1 }
   0x5   : > { %v196_v0 = vld [vmem:[%s796_s0] sm:$0xff] (!%p162_p2)  ;;  %v197_v1 = vld [vmem:[%s796_s0 + $0x8] sm:$0xff] (!%p162_p2)  ;;  %v611_v2 = vmov (!%p162_p2), 0.0|0.0   ;;  %vm612_vm0 = vmmov (!%p162_p2), 0   ;;  %v613_v4 = vmov (!%p162_p2), 0.0   ;;  %s554_s21 = sshll.u32 (!%p162_p2), %s647_s16, 3  ;;  %v290_v12 = vlaneseq (!%p162_p2) }
   0x6   : > { %165 = sbr.rel (%p162_p2) target bundleno = 3053 (0xbed), region = 36  ;;  %575 = vmatprep.subr.bf16.mxu0 (!%p162_p2), %v611_v2  ;;  %v576_v3 = vpack.c.bf16 (!%p162_p2), %v197_v1, %v196_v0  ;;  %572 = vmatprep.mubr.msk.f32.mxu0 (!%p162_p2), %vm612_vm0, %v613_v4  ;;  %s194_s24 = scalar_lea.vmem (!%p162_p2), %s796_s0, %s554_s21  ;;  %v198_v7 = vld [vmem:[%s796_s0 + $0x10] sm:$0xff] (!%p162_p2)  ;;  %v555_v8 = vld [vmem:[%s797_s1] ss:$0 sm:$0xff] (!%p162_p2)  ;;  %v292_v18 = vstv (!%p162_p2), %s554_s21  ;;  %vm614_vm3 = vmmov (!%p162_p2), 1   ;;  %vm319_vm8 = vcmask (!%p162_p2), 195584  }
   0x7   : > { %v195_v5 = vld [vmem:[%s194_s24] sm:$0xff] (!%p162_p2)  ;;  %v291_v16 = vshrl.u32 (!%p162_p2), %v290_v12, 7  ;;  %v671_v20 = vand.u32 (!%p162_p2), 127, %v290_v12  ;;  %p185_p3 = scmp.lt.s32.totalorder (!%p162_p2), %s647_s16, 2 }
   0x8   : > { %577 = vmatpush3.bf16.xpose.msra.mxu0 (!%p162_p2), %v576_v3  ;;  %v199_v6 = vmul.f32 (!%p162_p2), %v195_v5, %v195_v5 }
   0x9   : > { %570 = vmatprep.subr.mxu0 (!%p162_p2), %v613_v4  ;;  %v669_v19 = vadd.s32 (!%p162_p2), %v292_v18, %v291_v16  ;;  %vm297_vm2 = vcmp.lt.s32.totalorder (!%p162_p2), %v671_v20, 20 }
   0xa   : > { %200 = vadd.xlane.f32.xlu0 (!%p162_p2), %v199_v6 }
   0xb   : > { %vm296_vm1 = vcmp.eq.s32.totalorder (!%p162_p2), %v669_v19, %v671_v20 }
   0xc   : > { %vm298_vm4 = vmxor (!%p162_p2), %vm296_vm1, %vm614_vm3 }
   0xd   : > { %vm679_vm5 = vmand %vm298_vm4, %vm297_vm2  ;;  %s810_s16 = smov (!%p185_p3, %s647_s16), 2 }
   0xe   : > { %s552_s29 = sshll.u32 %s810_s16, 3 }
   0xf   : > { %s188_s6 = scalar_lea.vmem %s798_s2, %s552_s29  ;;  %s192_s11 = scalar_lea.vmem %s800_s4, %s552_s29 }
  0x10   : > { %571 = vmatpush3.xpose.msra.mxu0 %v198_v7  ;;  %v615_v7 = vmov 0  }
  0x11   : > { %591 = vset.pattern.permute.xlu1 %v615_v7  ;;  %592 = vset.pattern.permute.xlu0 %v615_v7 }
  0x13   : > { %573 = vmatmul.mubr.f32.vlgmr.msra.gmra.mrb[0].mxu0 %v195_v5 }
  0x97   : > { %v201_v9 = vpop.xlane.xlu0 %200 }
  0x98   : > { %v279_v10 = vadd.f32 %v555_v8, %v201_v9 }
  0xe6   : > { %v269_v11 = vpop.f32.mrb[0].mxu0 }
  0xe7   : > { %v280_v13 = vmul.f32 2.0, %v269_v11  ;;  %v574_v14 = vpop.f32.mrb[1].mxu0  ;;  %v301_v11 = vld [vmem:[%s188_s6] sm:$0xff] }
  0xe9   : > { %v281_v15 = vsub.f32 %v279_v10, %v280_v13 }
  0xeb   : > { %v282_v17 = vmax.f32 %v281_v15, 1e-12  ;;  %v556_v15 = vld [vmem:[%s799_s3] ss:$0 sm:$0xff] }
  0xed   : > { %593 = vrsqrt.f32 %v282_v17  ;;  %vm285_vm6 = vcmp.eq.f32.partialorder %v282_v17, inf  ;;  %v288_v24 = vand.u32 2147483648, %v282_v17  ;;  %vm287_vm7 = vcmp.eq.f32.partialorder %v282_v17, 0.0 }
  0xf7   : > { %v594_v21 = vpop.eup %593 }
  0xf8   : > { %v284_v22 = vmul.f32 %v594_v21, %v282_v17 }
  0xfa   : > { %v286_v25 = vsel %vm285_vm6, %v282_v17, %v284_v22 }
  0xfb   : > { %v683_v26 = vsel %vm287_vm7, %v288_v24, %v286_v25 }
  0xfc   : > { %v688_v27 = vsel %vm679_vm5, %v683_v26, 3e+38 }
  0xfd   : > { %v316_v28 = vand.u32 4294967264, %v688_v27  ;;  %v430_v23 = vsel %vm319_vm8, %v688_v27, inf }
  0xff   : > { %v317_v29 = vor.u32 %v316_v28, %v671_v20 }
 0x101   : > { %v320_v30 = vsel %vm319_vm8, %v317_v29, inf }
 0x102   : > { %321 = vmin.xlane.f32.xlu0 %v320_v30 }
 0x18f   : > { %v322_v31 = vpop.xlane.xlu0 %321 }
 0x190   : > { %vm323_vm9 = vcmp.eq.f32.partialorder %v317_v29, %v322_v31 }
 0x191   : > { %v324_v32 = vsel %vm323_vm9, 3e+38, %v317_v29 }
 0x192   : > { %v325_v33 = vsel %vm319_vm8, %v324_v32, inf }
 0x193   : > { %326 = vmin.xlane.f32.xlu1 %v325_v33 }
 0x220   : > { %v327_v34 = vpop.xlane.xlu1 %326 }
 0x221   : > { %vm328_vm10 = vcmp.eq.f32.partialorder %v324_v32, %v327_v34 }
 0x222   : > { %v329_v35 = vsel %vm328_vm10, 3e+38, %v324_v32 }
 0x223   : > { %v330_v36 = vsel %vm319_vm8, %v329_v35, inf }
 0x224   : > { %331 = vmin.xlane.f32.xlu1 %v330_v36 }
 0x2b1   : > { %v332_v37 = vpop.xlane.xlu1 %331 }
 0x2b2   : > { %vm333_vm11 = vcmp.eq.f32.partialorder %v329_v35, %v332_v37 }
 0x2b3   : > { %v334_v38 = vsel %vm333_vm11, 3e+38, %v329_v35 }
 0x2b4   : > { %v335_v39 = vsel %vm319_vm8, %v334_v38, inf }
 0x2b5   : > { %336 = vmin.xlane.f32.xlu0 %v335_v39 }
 0x342   : > { %v337_v40 = vpop.xlane.xlu0 %336 }
 0x343   : > { %vm338_vm12 = vcmp.eq.f32.partialorder %v334_v38, %v337_v40  ;;  %v438_v40 = vsub.f32 1.0, %v683_v26 }
 0x344   : > { %v339_v41 = vsel %vm338_vm12, 3e+38, %v334_v38 }
 0x345   : > { %v340_v42 = vsel %vm319_vm8, %v339_v41, inf }
 0x346   : > { %341 = vmin.xlane.f32.xlu1 %v340_v42 }
 0x3d3   : > { %v342_v43 = vpop.xlane.xlu1 %341 }
 0x3d4   : > { %vm343_vm13 = vcmp.eq.f32.partialorder %v339_v41, %v342_v43 }
 0x3d5   : > { %v344_v44 = vsel %vm343_vm13, 3e+38, %v339_v41  ;;  %v439_v41 = vmul.f32 30.0, %v438_v40 }
 0x3d6   : > { %v345_v45 = vsel %vm319_vm8, %v344_v44, inf }
 0x3d7   : > { %346 = vmin.xlane.f32.xlu0 %v345_v45 }
 0x464   : > { %v347_v46 = vpop.xlane.xlu0 %346 }
 0x465   : > { %vm348_vm14 = vcmp.eq.f32.partialorder %v344_v44, %v347_v46 }
 0x466   : > { %v349_v47 = vsel %vm348_vm14, 3e+38, %v344_v44 }
 0x467   : > { %v350_v48 = vsel %vm319_vm8, %v349_v47, inf }
 0x468   : > { %351 = vmin.xlane.f32.xlu1 %v350_v48 }
 0x4f5   : > { %v352_v49 = vpop.xlane.xlu1 %351 }
 0x4f6   : > { %vm353_vm15 = vcmp.eq.f32.partialorder %v349_v47, %v352_v49 }
 0x4f7   : > { %v354_v50 = vsel %vm353_vm15, 3e+38, %v349_v47 }
 0x4f8   : > { %v355_v51 = vsel %vm319_vm8, %v354_v50, inf }
 0x4f9   : > { %356 = vmin.xlane.f32.xlu0 %v355_v51 }
 0x586   : > { %v357_v52 = vpop.xlane.xlu0 %356 }
 0x587   : > { %vm358_vm0 = vcmp.eq.f32.partialorder %v354_v50, %v357_v52 }
 0x588   : > { %v359_v53 = vsel %vm358_vm0, 3e+38, %v354_v50 }
 0x589   : > { %v360_v54 = vsel %vm319_vm8, %v359_v53, inf }
 0x58a   : > { %361 = vmin.xlane.f32.xlu1 %v360_v54 }
 0x617   : > { %v362_v55 = vpop.xlane.xlu1 %361 }
 0x618   : > { %vm363_vm1 = vcmp.eq.f32.partialorder %v359_v53, %v362_v55 }
 0x619   : > { %v364_v56 = vsel %vm363_vm1, 3e+38, %v359_v53 }
 0x61a   : > { %v365_v57 = vsel %vm319_vm8, %v364_v56, inf }
 0x61b   : > { %366 = vmin.xlane.f32.xlu0 %v365_v57 }
 0x6a8   : > { %v367_v58 = vpop.xlane.xlu0 %366 }
 0x6a9   : > { %vm368_vm4 = vcmp.eq.f32.partialorder %v364_v56, %v367_v58 }
 0x6aa   : > { %v369_v59 = vsel %vm368_vm4, 3e+38, %v364_v56 }
 0x6ab   : > { %v370_v60 = vsel %vm319_vm8, %v369_v59, inf }
 0x6ac   : > { %371 = vmin.xlane.f32.xlu1 %v370_v60 }
 0x739   : > { %v372_v61 = vpop.xlane.xlu1 %371 }
 0x73a   : > { %vm373_vm6 = vcmp.eq.f32.partialorder %v369_v59, %v372_v61 }
 0x73b   : > { %v374_v62 = vsel %vm373_vm6, 3e+38, %v369_v59 }
 0x73c   : > { %v375_v63 = vsel %vm319_vm8, %v374_v62, inf }
 0x73d   : > { %376 = vmin.xlane.f32.xlu0 %v375_v63 }
 0x7ca   : > { %v377_v0 = vpop.xlane.xlu0 %376 }
 0x7cb   : > { %vm378_vm7 = vcmp.eq.f32.partialorder %v374_v62, %v377_v0 }
 0x7cc   : > { %v379_v1 = vsel %vm378_vm7, 3e+38, %v374_v62 }
 0x7cd   : > { %v380_v2 = vsel %vm319_vm8, %v379_v1, inf }
 0x7ce   : > { %381 = vmin.xlane.f32.xlu1 %v380_v2 }
 0x85b   : > { %v382_v3 = vpop.xlane.xlu1 %381 }
 0x85c   : > { %vm383_vm9 = vcmp.eq.f32.partialorder %v379_v1, %v382_v3 }
 0x85d   : > { %v384_v5 = vsel %vm383_vm9, 3e+38, %v379_v1  ;;  %vm470_vm9 = vcmask 7168  }
 0x85e   : > { %v385_v6 = vsel %vm319_vm8, %v384_v5, inf }
 0x85f   : > { %386 = vmin.xlane.f32.xlu0 %v385_v6 }
 0x8ec   : > { %v387_v8 = vpop.xlane.xlu0 %386 }
 0x8ed   : > { %vm388_vm10 = vcmp.eq.f32.partialorder %v384_v5, %v387_v8 }
 0x8ee   : > { %v389_v9 = vsel %vm388_vm10, 3e+38, %v384_v5  ;;  %vm476_vm10 = vcmask 15368  }
 0x8ef   : > { %v390_v10 = vsel %vm319_vm8, %v389_v9, inf }
 0x8f0   : > { %391 = vmin.xlane.f32.xlu1 %v390_v10 }
 0x901   : > { %304 = vperm.xlu1 %591, %v301_v11  }
 0x97d   : > { %v392_v12 = vpop.xlane.xlu1 %391 }
 0x97e   : > { %vm393_vm11 = vcmp.eq.f32.partialorder %v389_v9, %v392_v12 }
 0x97f   : > { %v394_v13 = vsel %vm393_vm11, 3e+38, %v389_v9 }
 0x980   : > { %v395_v14 = vsel %vm319_vm8, %v394_v13, inf }
 0x981   : > { %396 = vmin.xlane.f32.xlu0 %v395_v14  ;;  %v305_v16 = vpop.permute.xlu1 %304 }
 0x982   : > { %vm310_vm12 = vcmp.eq.s32.totalorder %v305_v16, %v556_v15 }
 0x983   : > { %vm724_vm13 = vmand %vm310_vm12, %vm679_vm5 }
 0x984   : > { %v416_v24 = vsel %vm724_vm13, %v683_v26, inf  ;;  %vm312_vm0 = vmxor %vm310_vm12, %vm614_vm3  ;;  %v478_v56 = vsel %vm724_vm13, %v683_v26, 0.0  ;;  %vm483_vm12 = vcmask 23568  }
 0x985   : > { %v417_v25 = vsel %vm319_vm8, %v416_v24, inf  ;;  %vm745_vm1 = vmand %vm312_vm0, %vm297_vm2  ;;  %v479_v57 = vsel %vm319_vm8, %v478_v56, 0.0 }
 0x986   : > { %v485_v58 = vsel %vm745_vm1, %v683_v26, 0.0 }
 0x987   : > { %v486_v59 = vsel %vm319_vm8, %v485_v58, 0.0 }
 0xa0e   : > { %v397_v17 = vpop.xlane.xlu0 %396 }
 0xa0f   : > { %vm398_vm14 = vcmp.eq.f32.partialorder %v394_v13, %v397_v17 }
 0xa10   : > { %v399_v21 = vsel %vm398_vm14, 3e+38, %v394_v13  ;;  %vm490_vm14 = vcmask 31768  }
 0xa11   : > { %v400_v22 = vsel %vm319_vm8, %v399_v21, inf }
 0xa12   : > { %401 = vmin.xlane.f32.xlu0 %v400_v22 }
 0xa16   : > { %418 = vmin.xlane.f32.xlu0 %v417_v25 }
 0xa1a   : > { %431 = vmin.xlane.f32.xlu0 %v430_v23 }
 0xa9f   : > { %v402_v28 = vpop.xlane.xlu0 %401 }
 0xaa0   : > { %vm403_vm5 = vcmp.eq.f32.partialorder %v399_v21, %v402_v28 }
 0xaa1   : > { %v404_v29 = vsel %vm403_vm5, %v688_v27, inf }
 0xaa2   : > { %v405_v30 = vsel %vm319_vm8, %v404_v29, inf }
 0xaa3   : > { %406 = vmin.xlane.f32.xlu0 %v405_v30  ;;  %v419_v31 = vpop.xlane.xlu0 %418 }
 0xaa4   : > { %vm420_vm15 = vcmp.lt.f32.partialorder %v419_v31, 3e+38 }
 0xaa5   : > { %v737_v32 = vsel %vm420_vm15, %v419_v31, 1.0 }
 0xaa6   : > { %v433_v33 = vsub.f32 1.0, %v737_v32 }
 0xaa7   : > { %v432_v34 = vpop.xlane.xlu0 %431 }
 0xaa8   : > { %v435_v35 = vsub.f32 1.0, %v432_v34  ;;  %v434_v36 = vmul.f32 30.0, %v433_v33 }
 0xaaa   : > { %v436_v37 = vmul.f32 30.0, %v435_v35 }
 0xaac   : > { %v437_v38 = vmax.f32 %v436_v37, %v434_v36 }
 0xaae   : > { %v452_v39 = vsub.f32 %v434_v36, %v437_v38  ;;  %v440_v42 = vsub.f32 %v439_v41, %v437_v38 }
 0xab0   : > { %v441_v27 = vmul.f32 1.442695, %v440_v42  ;;  %v453_v60 = vmul.f32 1.442695, %v452_v39 }
 0xab2   : > { %595 = vpow2.f32 %v441_v27 }
 0xab3   : > { %597 = vpow2.f32 %v453_v60 }
 0xabc   : > { %v596_v45 = vpop.eup %595 }
 0xabd   : > { %v598_v63 = vpop.eup %597 }
 0xb30   : > { %v407_v43 = vpop.xlane.xlu0 %406 }
 0xb31   : > { %vm408_vm4 = vcmp.lt.f32.partialorder %v683_v26, %v407_v43 }
 0xb32   : > { %vm752_vm6 = vmand %vm724_vm13, %vm408_vm4 }
 0xb33   : > { %vm410_vm7 = vmand %vm745_vm1, %vm408_vm4  ;;  %v443_v47 = vsel %vm752_vm6, %v596_v45, 0.0  ;;  %v557_v20 = vsel %vm752_vm6, 1.0, %v613_v4  ;;  %v422_v52 = vsel %vm752_vm6, %v683_v26, inf  ;;  %v426_v54 = vsel %vm752_vm6, %v683_v26, -inf }
 0xb34   : > { %v444_v48 = vsel %vm319_vm8, %v443_v47, 0.0  ;;  %v413_v49 = vsel %vm319_vm8, %v557_v20, 0.0  ;;  %v447_v50 = vsel %vm410_vm7, %v596_v45, 0.0  ;;  %v423_v53 = vsel %vm319_vm8, %v422_v52, inf }
 0xb35   : > { %445 = vadd.xlane.f32.xlu0 %v444_v48  ;;  %414 = vadd.xlane.f32.xlu1 %v413_v49  ;;  %v448_v51 = vsel %vm319_vm8, %v447_v50, 0.0  ;;  %v427_v55 = vsel %vm319_vm8, %v426_v54, -inf  ;;  %vm300_vm8 = vcmp.lt.s32.totalorder %v669_v19, 20 }
 0xb36   : > { %v558_v15 = vsel %vm300_vm8, 1.0, %v613_v4 }
 0xb39   : > { %449 = vadd.xlane.f32.xlu0 %v448_v51 }
 0xb3d   : > { %424 = vmin.xlane.f32.xlu0 %v423_v53 }
 0xb41   : > { %428 = vmax.xlane.f32.xlu0 %v427_v55 }
 0xb45   : > { %480 = vadd.xlane.f32.xlu0 %v479_v57 }
 0xb49   : > { %487 = vadd.xlane.f32.xlu0 %v486_v59 }
 0xbc2   : > { %v446_v61 = vpop.xlane.xlu0 %445  ;;  %v415_v62 = vpop.xlane.xlu1 %414 }
 0xbc3   : > { %vm451_vm2 = vcmp.eq.f32.partialorder %v415_v62, 0.0  ;;  %vm462_vm3 = vcmp.eq.f32.partialorder %v415_v62, 1.0 }
 0xbc4   : > { %v455_v1 = vsel %vm451_vm2, %v598_v63, %v446_v61 }
 0xbc6   : > { %v450_v0 = vpop.xlane.xlu0 %449 }
 0xbc7   : > { %v456_v2 = vadd.f32 %v455_v1, %v450_v0 }
 0xbc9   : > { %599 = vrcp.f32 %v456_v2 }
 0xbca   : > { %v425_v6 = vpop.xlane.xlu0 %424 }
 0xbce   : > { %v429_v26 = vpop.xlane.xlu0 %428 }
 0xbcf   : > { %v463_v7 = vsub.f32 %v429_v26, %v425_v6 }
 0xbd1   : > { %v464_v10 = vsel %vm462_vm3, %v429_v26, %v463_v7 }
 0xbd2   : > { %v481_v11 = vpop.xlane.xlu0 %480  ;;  %v465_v13 = vsel %vm451_vm2, %v737_v32, %v464_v10 }
 0xbd3   : > { %v600_v3 = vpop.eup %599  ;;  %v482_v18 = vmul.f32 %v558_v15, %v481_v11 }
 0xbd4   : > { %v458_v5 = vmul.f32 %v600_v3, %v455_v1 }
 0xbd6   : > { %601 = vlog2.f32 %v458_v5  ;;  %v488_v17 = vpop.xlane.xlu0 %487 }
 0xbd7   : > { %v489_v21 = vmul.f32 %v558_v15, %v488_v17 }
 0xbe0   : > { %v602_v8 = vpop.eup %601 }
 0xbe1   : > { %v460_v9 = vmul.f32 0.6931472, %v602_v8 }
 0xbe3   : > { %v461_v12 = vsub.f32 0.0, %v460_v9 }
 0xbe5   : > { %v466_v14 = vadd.f32 %v465_v13, %v461_v12 }
 0xbe7   : > { %v469_v16 = vsel %vm300_vm8, %v466_v14, 0.0  ;;  %vm472_vm11 = vcmp.lt.f32.partialorder %v466_v14, 0.6 }
 0xbe8   : > { %471 = vst.msk [vmem:[%s192_s11] sm:$0xff] %vm470_vm9, %v469_v16  ;;  %vm473_vm13 = vmand %vm300_vm8, %vm472_vm11 }
 0xbe9   : > { %v559_v19 = vsel %vm473_vm13, 1.0, %v613_v4 }
 0xbea   : > { %477 = vst.msk [vmem:[%s192_s11] sm:$0xff] %vm476_vm10, %v559_v19 }
 0xbeb   : > { %484 = vst.msk [vmem:[%s192_s11] sm:$0xff] %vm483_vm12, %v482_v18 }
 0xbec   : > { %491 = vst.msk [vmem:[%s192_s11] sm:$0xff] %vm490_vm14, %v489_v21 }
 0xbed PF: > { %s14_s15 = sadd.s32 1, %s609_s15  }
 0xbee   : > { %p11_p4 = scmp.ge.s32.totalorder %s14_s15, 5  }
 0xbf0   :  { %13 = sbr.rel (!%p11_p4) target bundleno = 1 (0x1), region = 67 }

</bundles_post_ra>
